<compile_context>
chip_gen: v5e
topology: v5e:2x2
jax: 0.10.0
libtpu: 0.0.40
codegen_flags: <defaults>
</compile_context>

<pallas_src>
import math

import jax
import jax.numpy as jnp
from jax.experimental import pallas as pl
from jax.experimental.pallas import tpu as pltpu


def _autoencoder_kernel(x_ref, w1_ref, b1_ref, w23_ref, b23_ref, out_ref):
    # encoder: single dense K=H matmul, f32 accumulation.
    h = jnp.dot(x_ref[...], w1_ref[...], preferred_element_type=jnp.float32)
    h = jnp.tanh(h + b1_ref[...])                       # [tb, 128] f32
    # TODO(synk): nn.Dropout(0.5) is identity in eval mode; training-mode
    # stochastic masking (pltpu.prng_*) is intentionally not implemented.

    # fused bottleneck+decoder: sigmoid(h @ (w2 @ w3) + (b2 @ w3 + b3)).
    d = jnp.dot(h.astype(w23_ref.dtype), w23_ref[...],
                preferred_element_type=jnp.float32)     # [tb, H] f32
    out_ref[...] = jax.nn.sigmoid(d + b23_ref[...]).astype(out_ref.dtype)


def _choose_batch_tile(B, block_b, row_bytes):
    """Batch tile that (a) divides B when possible (no pad + no slice),
    (b) is a multiple of 8 unless it equals the full batch dim, (c) fits an
    ~8 MiB x/out streaming budget, (d) gives >= 2 grid steps when cheap so
    v7x's two TensorCores are both used."""
    cap = max(8, ((8 << 20) // max(row_bytes, 1)) // 8 * 8)
    limit = max(8, min((block_b // 8) * 8 if block_b >= 8 else 8, cap))

    if B <= limit:
        if B >= 32 and B % 16 == 0:
            return B // 2, B            # 2 grid steps, still no padding
        return B, B                     # full-extent tile (legal for any B)

    # B > limit: largest multiple-of-8 divisor of B that fits the budget.
    for t in range(limit, 7, -8):
        if B % t == 0:
            return t, B

    # Fall back: pad the batch; pad rows are sliced off afterwards.
    tb = limit
    b_pad = ((B + tb - 1) // tb) * tb
    return tb, b_pad


def base_autoencoder_forward(inputs, params, *, block_b=1024,
                             compute_dtype=jnp.bfloat16,
                             out_dtype=jnp.bfloat16):
    """inputs: list of [B, d_i] arrays; params: dict from init_params."""
    B = int(inputs[0].shape[0])
    dims = [int(x.shape[1]) for x in inputs]
    H = sum(dims)
    assert params["w1"].shape == (H, 128)

    # torch.cat fused into one concat+cast pass in the wrapper; the kernel
    # then streams a single [B, H] bf16 array (one dense encoder dot).
    x = jnp.concatenate([xi.astype(compute_dtype) for xi in inputs], axis=1)

    # algebraic fusion of bottleneck + decoder (linear o linear).
    w23 = (params["w2"] @ params["w3"]).astype(compute_dtype)   # [128, H]
    b23 = params["b2"] @ params["w3"] + params["b3"]            # [1, H] f32
    w1 = params["w1"].astype(compute_dtype)                     # [H, 128]
    b1 = params["b1"]                                           # [1, 128] f32

    x_item = jnp.dtype(compute_dtype).itemsize
    o_item = jnp.dtype(out_dtype).itemsize
    row_bytes = 2 * H * (x_item + o_item)        # double-buffered x + out row
    tb, b_pad = _choose_batch_tile(B, block_b, row_bytes)
    if b_pad != B:
        x = jnp.pad(x, ((0, b_pad - B), (0, 0)))

    grid = (b_pad // tb,)

    # Explicit VMEM budget (v7x: 64 MiB physical / 32 MiB default scoped;
    # v5e default scoped is only 16 MiB).
    w_bytes = (H * 128 + 128 * H) * x_item
    b_bytes = (128 + H) * 4
    vmem_needed = 2 * tb * H * (x_item + o_item) + 2 * (w_bytes + b_bytes)
    vmem_limit = int(min(max(2 * vmem_needed + (4 << 20), 32 << 20), 64 << 20))

    cost = pl.CostEstimate(
        flops=2 * b_pad * (H * 128 + 128 * H),
        transcendentals=b_pad * (128 + H),
        bytes_accessed=(b_pad * H * (x_item + o_item) + w_bytes + b_bytes),
    )

    out = pl.pallas_call(
        _autoencoder_kernel,
        out_shape=jax.ShapeDtypeStruct((b_pad, H), out_dtype),
        grid=grid,
        in_specs=[
            pl.BlockSpec((tb, H), lambda i: (i, 0)),      # x  (streamed)
            pl.BlockSpec((H, 128), lambda i: (0, 0)),     # w1 (resident)
            pl.BlockSpec((1, 128), lambda i: (0, 0)),     # b1
            pl.BlockSpec((128, H), lambda i: (0, 0)),     # w23
            pl.BlockSpec((1, H), lambda i: (0, 0)),       # b23
        ],
        out_specs=pl.BlockSpec((tb, H), lambda i: (i, 0)),
        compiler_params=pltpu.CompilerParams(
            dimension_semantics=("parallel",),
            vmem_limit_bytes=vmem_limit),
        cost_estimate=cost,
    )(x, w1, b1, w23, b23)

    return out if b_pad == B else out[:B]


def init_params(key, hidden_dim, n_out):
    """Deterministic init mimicking torch.nn.Linear (uniform +-1/sqrt(fan_in)).

    Weights are stored transposed, i.e. shape (in_features, out_features).
    """
    def linear(key, fan_in, fan_out):
        kw, kb = jax.random.split(key)
        bound = 1.0 / math.sqrt(fan_in)
        w = jax.random.uniform(kw, (fan_in, fan_out), jnp.float32, -bound, bound)
        b = jax.random.uniform(kb, (1, fan_out), jnp.float32, -bound, bound)
        return w, b

    k1, k2, k3 = jax.random.split(key, 3)
    w1, b1 = linear(k1, hidden_dim, 128)    # encoder Linear(H, 128)
    w2, b2 = linear(k2, 128, n_out)         # bottleneck Linear(128, n_out)
    w3, b3 = linear(k3, n_out, hidden_dim)  # decoder Linear(n_out, H)
    return dict(w1=w1, b1=b1, w2=w2, b2=b2, w3=w3, b3=b3)


def reference_forward_matched(inputs, params, compute_dtype=jnp.bfloat16):
    """Same math as the kernel (fused W23, bf16 matmul operands, f32 accum)."""
    x = jnp.concatenate(inputs, axis=1).astype(compute_dtype)
    h = jnp.tanh(
        jnp.dot(x, params["w1"].astype(compute_dtype),
                preferred_element_type=jnp.float32) + params["b1"])
    w23 = (params["w2"] @ params["w3"]).astype(compute_dtype)
    b23 = params["b2"] @ params["w3"] + params["b3"]
    return jax.nn.sigmoid(
        jnp.dot(h.astype(compute_dtype), w23,
                preferred_element_type=jnp.float32) + b23)


def reference_forward_f32(inputs, params):
    """Exact (unfused, f32) PyTorch-module math, eval mode."""
    x = jnp.concatenate(inputs, axis=1).astype(jnp.float32)
    h = jnp.tanh(x @ params["w1"] + params["b1"])
    z = h @ params["w2"] + params["b2"]
    return jax.nn.sigmoid(z @ params["w3"] + params["b3"])


if __name__ == "__main__":
    # Small shapes consistent with the module: input_dims=[4, 12, 16] -> H=32.
    input_dims = (4, 12, 16)
    hidden_dim = sum(input_dims)          # 32
    n_out = 8
    batch = 8

    key = jax.random.PRNGKey(0)
    k_params, *k_inputs = jax.random.split(key, 1 + len(input_dims))

    params = init_params(k_params, hidden_dim, n_out)
    inputs = [
        jax.random.normal(k, (batch, d), jnp.float32)
        for k, d in zip(k_inputs, input_dims)
    ]

    out = jax.block_until_ready(base_autoencoder_forward(inputs, params))
    out_f32 = out.astype(jnp.float32)

    ref_matched = reference_forward_matched(inputs, params)
    ref_f32 = reference_forward_f32(inputs, params)

    assert out.shape == (batch, hidden_dim), out.shape
    assert out.dtype == jnp.bfloat16, out.dtype
    # Same f32 math, only the final bf16 output cast differs (<= ~2e-3 abs).
    assert jnp.allclose(out_f32, ref_matched, atol=1e-2, rtol=1e-2), (
        "mismatch vs matched-precision reference, max abs diff = "
        f"{float(jnp.max(jnp.abs(out_f32 - ref_matched)))}")
    # bf16 matmul operands + bf16 output vs the pure-f32 module: loose check.
    assert jnp.allclose(out_f32, ref_f32, atol=5e-2, rtol=5e-2), (
        "mismatch vs f32 module reference, max abs diff = "
        f"{float(jnp.max(jnp.abs(out_f32 - ref_f32)))}")

    print("KERNEL_OK")
</pallas_src>

<mosaic_0001>
module attributes {stable_mosaic.version = 11 : i64} {
  func.func @_autoencoder_kernel(%arg0: i32, %arg1: memref<8x32xbf16, #tpu.memory_space<vmem>>, %arg2: memref<32x128xbf16, #tpu.memory_space<vmem>>, %arg3: memref<1x128xf32, #tpu.memory_space<vmem>>, %arg4: memref<128x32xbf16, #tpu.memory_space<vmem>>, %arg5: memref<1x32xf32, #tpu.memory_space<vmem>>, %arg6: memref<8x32xbf16, #tpu.memory_space<vmem>>) attributes {dimension_semantics = [#tpu.dimension_semantics<parallel>], iteration_bounds = array<i64: 1>, scalar_prefetch = 0 : i64, scratch_operands = 0 : i64, tpu.core_type = #tpu.core_type<tc>, window_params = [{transform_indices = @transform_0, window_bounds = array<i64: 8, 32>}, {pipeline_mode = #tpu.pipeline_mode<synchronous>, transform_indices = @transform_1, window_bounds = array<i64: 32, 128>}, {pipeline_mode = #tpu.pipeline_mode<synchronous>, transform_indices = @transform_2, window_bounds = array<i64: 1, 128>}, {pipeline_mode = #tpu.pipeline_mode<synchronous>, transform_indices = @transform_3, window_bounds = array<i64: 128, 32>}, {pipeline_mode = #tpu.pipeline_mode<synchronous>, transform_indices = @transform_4, window_bounds = array<i64: 1, 32>}, {transform_indices = @transform_5, window_bounds = array<i64: 8, 32>}]} {
    %c0 = arith.constant 0 : index
    %c0_0 = arith.constant 0 : index
    %0 = vector.load %arg1[%c0, %c0_0] : memref<8x32xbf16, #tpu.memory_space<vmem>>, vector<8x32xbf16>
    %c0_1 = arith.constant 0 : index
    %c0_2 = arith.constant 0 : index
    %1 = vector.load %arg2[%c0_1, %c0_2] : memref<32x128xbf16, #tpu.memory_space<vmem>>, vector<32x128xbf16>
    %cst = arith.constant dense<0.000000e+00> : vector<8x128xf32>
    %2 = tpu.matmul %0, %1, %cst {dimension_numbers = #tpu.dot_dimension_numbers<[1], [0], [0], [1], [0, 0, 1, 1], [], []>} : vector<8x32xbf16>, vector<32x128xbf16>, vector<8x128xf32> -> vector<8x128xf32>
    %c0_3 = arith.constant 0 : index
    %c0_4 = arith.constant 0 : index
    %3 = vector.load %arg3[%c0_3, %c0_4] : memref<1x128xf32, #tpu.memory_space<vmem>>, vector<1x128xf32>
    %4 = vector.broadcast %3 : vector<1x128xf32> to vector<8x128xf32>
    %5 = arith.addf %2, %4 : vector<8x128xf32>
    %6 = math.tanh %5 : vector<8x128xf32>
    %7 = arith.truncf %6 : vector<8x128xf32> to vector<8x128xbf16>
    %c0_5 = arith.constant 0 : index
    %c0_6 = arith.constant 0 : index
    %8 = vector.load %arg4[%c0_5, %c0_6] : memref<128x32xbf16, #tpu.memory_space<vmem>>, vector<128x32xbf16>
    %cst_7 = arith.constant dense<0.000000e+00> : vector<8x32xf32>
    %9 = tpu.matmul %7, %8, %cst_7 {dimension_numbers = #tpu.dot_dimension_numbers<[1], [0], [0], [1], [0, 0, 1, 1], [], []>} : vector<8x128xbf16>, vector<128x32xbf16>, vector<8x32xf32> -> vector<8x32xf32>
    %c0_8 = arith.constant 0 : index
    %c0_9 = arith.constant 0 : index
    %10 = vector.load %arg5[%c0_8, %c0_9] : memref<1x32xf32, #tpu.memory_space<vmem>>, vector<1x32xf32>
    %11 = vector.broadcast %10 : vector<1x32xf32> to vector<8x32xf32>
    %12 = arith.addf %9, %11 : vector<8x32xf32>
    %13 = arith.negf %12 : vector<8x32xf32>
    %14 = math.exp %13 : vector<8x32xf32>
    %cst_10 = arith.constant 1.000000e+00 : f32
    %15 = vector.broadcast %cst_10 : f32 to vector<8x32xf32>
    %16 = arith.addf %15, %14 : vector<8x32xf32>
    %17 = arith.divf %15, %16 : vector<8x32xf32>
    %18 = arith.truncf %17 : vector<8x32xf32> to vector<8x32xbf16>
    %c0_11 = arith.constant 0 : index
    %c0_12 = arith.constant 0 : index
    %19 = vector.load %arg6[%c0_11, %c0_12] : memref<8x32xbf16, #tpu.memory_space<vmem>>, vector<8x32xbf16>
    tpu.vector_store %arg6[%c0_11, %c0_12], %18 {strides = array<i32>} : memref<8x32xbf16, #tpu.memory_space<vmem>>, vector<8x32xbf16>,
    return
  }
  func.func @transform_0(%arg0: i32) -> (i32, i32) {
    %c0_i32 = arith.constant 0 : i32
    %c0_i32_0 = arith.constant 0 : i32
    return %arg0, %c0_i32 : i32, i32
  }
  func.func @transform_1(%arg0: i32) -> (i32, i32) {
    %c0_i32 = arith.constant 0 : i32
    %c0_i32_0 = arith.constant 0 : i32
    %c0_i32_1 = arith.constant 0 : i32
    return %c0_i32, %c0_i32_0 : i32, i32
  }
  func.func @transform_2(%arg0: i32) -> (i32, i32) {
    %c0_i32 = arith.constant 0 : i32
    %c0_i32_0 = arith.constant 0 : i32
    %c0_i32_1 = arith.constant 0 : i32
    return %c0_i32, %c0_i32_0 : i32, i32
  }
  func.func @transform_3(%arg0: i32) -> (i32, i32) {
    %c0_i32 = arith.constant 0 : i32
    %c0_i32_0 = arith.constant 0 : i32
    %c0_i32_1 = arith.constant 0 : i32
    return %c0_i32, %c0_i32_0 : i32, i32
  }
  func.func @transform_4(%arg0: i32) -> (i32, i32) {
    %c0_i32 = arith.constant 0 : i32
    %c0_i32_0 = arith.constant 0 : i32
    %c0_i32_1 = arith.constant 0 : i32
    return %c0_i32, %c0_i32_0 : i32, i32
  }
  func.func @transform_5(%arg0: i32) -> (i32, i32) {
    %c0_i32 = arith.constant 0 : i32
    %c0_i32_0 = arith.constant 0 : i32
    return %arg0, %c0_i32 : i32, i32
  }
}

</mosaic_0001>

<bundles_post_ra>
// kernel: tpu_custom_call.1
= control target key start
LH: loop header
LB: loop body
LE: loop exit
PB: predicated region body
PF: predicated region fallthrough
CT: control target
= control target key end

     0   :  { %s341_s0 = inlined_call_operand.vmem [shape: bf16[8,32], index: 0, kind: input, shape index: {}]   ;;  %s342_s1 = inlined_call_operand.vmem [shape: bf16[32,128], index: 1, kind: input, shape index: {}]   ;;  %s343_s2 = inlined_call_operand.vmem [shape: f32[1,128], index: 2, kind: input, shape index: {}]   ;;  %s344_s3 = inlined_call_operand.vmem [shape: bf16[128,32], index: 3, kind: input, shape index: {}]   ;;  %s345_s4 = inlined_call_operand.vmem [shape: f32[1,32], index: 4, kind: input, shape index: {}]   ;;  %s346_s5 = inlined_call_operand.hbm [shape: bf16[8,32], index: 5, kind: output, shape index: {}]  }
   0x1   :  { %v224_v0 = vld [vmem:[%s342_s1 + $0x8] sm:$0xff]  ;;  %v232_v1 = vld [vmem:[%s344_s3 + $0x38] sm:$0xff]  ;;  %v223_v2 = vld [vmem:[%s342_s1] sm:$0xff] }
   0x2   :  { %53 = vmatpush.bf16.msra.mxu0 %v224_v0  ;;  %130 = vmatpush.bf16.msra.mxu1 %v232_v1  ;;  %v231_v3 = vld [vmem:[%s344_s3 + $0x30] sm:$0xff] }
   0x3   :  { %10 = vsyncpa [#allocation3], 0  ;;  %v22_v4 = vld [vmem:[%s341_s0] sm:$0xf]  ;;  %vm43_vm0 = vcmask 261120   ;;  %v230_v5 = vld [vmem:[%s344_s3 + $0x28] sm:$0xff] }
   0x4   :  { %v229_v6 = vld [vmem:[%s344_s3 + $0x20] sm:$0xff]  ;;  %v228_v7 = vld [vmem:[%s344_s3 + $0x18] sm:$0xff]  ;;  %v227_v8 = vld [vmem:[%s344_s3 + $0x10] sm:$0xff]  ;;  %s172_s18 = sshll.u32 %s346_s5, 4  ;;  %vm163_vm5 = vcmask 257024   ;;  %s173_s18 = int_to_ptr.hbm [resolvable:$true] %s172_s18 }
   0x5   :  { %v226_v9 = vld [vmem:[%s344_s3 + $0x8] sm:$0xff]  ;;  %v225_v10 = vld [vmem:[%s344_s3] sm:$0xff] }
   0x6   :  { %54 = vmatpush.bf16.msra.mxu0 %v223_v2  ;;  %131 = vmatpush.bf16.msra.mxu1 %v231_v3  ;;  %v234_v11 = vld [vmem:[%s343_s2] ss:$0 sm:$0xff]  ;;  %s268_s2 = smov [#allocation2]  }
   0x7   :  { %v235_v17 = vld [vmem:[%s345_s4] ss:$0 sm:$0xff]  ;;  %s170_s3 = sshll.u32 %s268_s2, 4  ;;  %s171_s3 = int_to_ptr.vmem [resolvable:$true] %s170_s3 }
   0x9   :  { %189 = vmatmul.msk.bf16.vlgmr.msra.gmra.mxu0 %vm43_vm0, %v22_v4 }
   0xa   :  { %132 = vmatpush.bf16.msra.mxu1 %v230_v5 }
   0xe   :  { %133 = vmatpush.bf16.msra.mxu1 %v229_v6 }
  0x12   :  { %134 = vmatpush.bf16.msra.mxu1 %v228_v7 }
  0x16   :  { %135 = vmatpush.bf16.msra.mxu1 %v227_v8 }
  0x1a   :  { %136 = vmatpush.bf16.msra.mxu1 %v226_v9 }
  0x1e   :  { %137 = vmatpush.bf16.msra.mxu1 %v225_v10 }
  0x86   :  { %v56_v12 = vpop.f32.mrf.mxu0 }
  0x87   :  { %v57_v13 = vadd.f32 %v234_v11, %v56_v12 }
  0x89   :  { %236 = vtanh.f32 %v57_v13 }
  0x8e   :  { %v58_v14 = vpop.f32.mrf.mxu0 }
  0x8f   :  { %v237_v15 = vpop.eup %236 }
  0x90   :  { %v61_v16 = vpack.c.bf16 %v237_v15, %v237_v15 }
  0x92   :  { %138 = vmatmul.bf16.vlgmr.msra.gmra.mxu1 %v61_v16 }
 0x10f   :  { %v139_v18 = vpop.f32.mrf.mxu1 }
 0x110   :  { %v140_v19 = vadd.f32 %v235_v17, %v139_v18 }
 0x112   :  { %v222_v20 = vmul.f32 -1.442695, %v140_v19 }
 0x114   :  { %238 = vpow2.f32 %v222_v20 }
 0x117   :  { %v141_v21 = vpop.f32.mrf.mxu1 }
 0x11a   :  { %v239_v22 = vpop.eup %238 }
 0x11b   :  { %v146_v23 = vadd.f32 1.0, %v239_v22 }
 0x11d   :  { %240 = vrcp.f32 %v146_v23  ;;  %v158_v27 = vand.u32 2147483648, %v146_v23  ;;  %v156_v29 = vand.u32 2147483647, %v146_v23  ;;  %vm152_vm2 = vweird.f32 %v146_v23 }
 0x11f   :  { %v159_v31 = vor.u32 1.1754944e-38, %v158_v27  ;;  %vm157_vm4 = vcmp.eq.f32.partialorder %v156_v29, 8.507059e+37 }
 0x123   :  { %v241_v24 = vpop.eup %240 }
 0x124   :  { %v148_v25 = vmul.f32 %v241_v24, %v146_v23  ;;  %vm153_vm1 = vweird.f32 %v241_v24 }
 0x125   :  { %vm154_vm3 = vmor %vm152_vm2, %vm153_vm1 }
 0x126   :  { %v149_v26 = vsub.f32 1.0, %v148_v25 }
 0x128   :  { %v150_v28 = vmul.f32 %v241_v24, %v149_v26 }
 0x12a   :  { %v151_v30 = vadd.f32 %v241_v24, %v150_v28 }
 0x12c   :  { %v155_v32 = vsel %vm154_vm3, %v241_v24, %v151_v30 }
 0x12d   :  { %v160_v33 = vsel %vm157_vm4, %v159_v31, %v155_v32 }
 0x12e   :  { %v162_v34 = vpack.c.bf16 %v160_v33, %v160_v33 }
 0x130   :  { %164 = vst.msk [vmem:[#allocation2] sm:$0xf] %vm163_vm5, %v162_v34 }
 0x131   :  { %175 = dma.vmem_to_hbm [thread:$0]  %s171_s3, 64, %s173_s18, [#allocation3]  }
 0x132   :  { %266 = dma.done.wait [#allocation3], 64  }
 0x133   :  { %267 = vsyncadd [#allocation3], 4294967232 }
 0x134   :  { %180 = vsyncpa [#allocation3], 1 }

</bundles_post_ra>
